<compile_context>
chip_gen: v7x
topology: tpu7x:2x2x1
jax: 0.10.0
libtpu: 0.0.40
codegen_flags: <defaults>
</compile_context>

<pallas_src>
import functools

import numpy as np
import jax
import jax.numpy as jnp
from jax.experimental import pallas as pl
from jax.experimental.pallas import tpu as pltpu

E_LAMBDA = 1e-4   # SimAM e_lambda
BN_EPS = 1e-5     # nn.BatchNorm2d default eps


# --------------------------------------------------------------------------------------
# Kernels: one image per grid step, layout (C, H*W) with H*W on the lane axis.
# --------------------------------------------------------------------------------------

def _simam_conv1_kernel(x_ref, w1_ref, h1_ref, st_ref, *, hw, matmul_dtype):
    """SimAM attention + conv1 (1x1) + per-image BN1 partial statistics."""
    f32 = jnp.float32
    x = x_ref[...].astype(f32)                               # (Cin, HW)
    inv_hw = 1.0 / hw
    mu = jnp.sum(x, axis=1, keepdims=True) * inv_hw          # (Cin, 1) spatial mean
    d = x - mu
    d2 = d * d
    ssum = jnp.sum(d2, axis=1, keepdims=True)                # (Cin, 1)
    # y = d2 / (4*(ssum/(hw-1) + e_lambda)) + 0.5  -- divide replaced by EUP reciprocal
    inv_den = pl.reciprocal(4.0 * (ssum * (1.0 / (hw - 1)) + E_LAMBDA), approx=True)
    y = d2 * inv_den + 0.5
    sig = pl.reciprocal(1.0 + jnp.exp(-y), approx=True)      # sigmoid via EUP exp + rcp
    att = x * sig                                            # (Cin, HW)

    h1 = jnp.dot(w1_ref[...], att.astype(matmul_dtype),
                 preferred_element_type=f32)                 # (C2, HW), f32 accumulate
    h1_ref[...] = h1.astype(h1_ref.dtype)                    # stored bf16

    m = jnp.sum(h1, axis=1, keepdims=True) * inv_hw          # stats on exact f32 values
    m2 = jnp.sum((h1 - m) * (h1 - m), axis=1, keepdims=True)  # centered sum of squares
    st_ref[...] = jnp.concatenate([m, m2], axis=1)           # (C2, 2)


def _bn1_conv2_kernel(h1_ref, s_ref, t_ref, w2_ref, mask_ref, h2_ref, st_ref,
                      *, h, w, matmul_dtype):
    """Folded BN1+ReLU, then conv2 (3x3, pad 1) as one K=9*C2 matmul, + BN2 stats."""
    f32 = jnp.float32
    hw = h * w
    a = jnp.maximum(h1_ref[...].astype(f32) * s_ref[...] + t_ref[...], 0.0)  # (C2, HW)

    # im2col slab: 9 circular lane shifts + precomputed edge masks (zero the halo).
    taps = []
    tap = 0
    for dh in (-1, 0, 1):
        for dw in (-1, 0, 1):
            d = (dh * w + dw) % hw
            if d == 0:
                shifted = a
            else:
                # circular lane rotation: shifted[:, p] = a[:, (p + d) % hw]
                shifted = jnp.concatenate([a[:, d:], a[:, :d]], axis=1)
            taps.append(shifted * mask_ref[tap:tap + 1, :])
            tap += 1
    col = jnp.concatenate(taps, axis=0).astype(matmul_dtype)      # (9*C2, HW)

    h2 = jnp.dot(w2_ref[...], col, preferred_element_type=f32)    # (C2, HW)
    h2_ref[...] = h2.astype(h2_ref.dtype)                         # stored bf16

    inv_hw = 1.0 / hw
    m = jnp.sum(h2, axis=1, keepdims=True) * inv_hw
    m2 = jnp.sum((h2 - m) * (h2 - m), axis=1, keepdims=True)
    st_ref[...] = jnp.concatenate([m, m2], axis=1)                # (C2, 2)


def _bn2_conv3_kernel(h2_ref, s_ref, t_ref, w3_ref, h3_ref, st_ref, *, hw, matmul_dtype):
    """Folded BN2+ReLU, conv3 (1x1), + BN3 stats."""
    f32 = jnp.float32
    a = jnp.maximum(h2_ref[...].astype(f32) * s_ref[...] + t_ref[...], 0.0)   # (C2, HW)
    h3 = jnp.dot(w3_ref[...], a.astype(matmul_dtype),
                 preferred_element_type=f32)                      # (C3, HW)
    h3_ref[...] = h3.astype(h3_ref.dtype)                         # stored bf16
    inv_hw = 1.0 / hw
    m = jnp.sum(h3, axis=1, keepdims=True) * inv_hw
    m2 = jnp.sum((h3 - m) * (h3 - m), axis=1, keepdims=True)
    st_ref[...] = jnp.concatenate([m, m2], axis=1)                # (C3, 2)


def _bn3_residual_kernel(h3_ref, s_ref, t_ref, x_ref, o_ref):
    """Folded BN3, residual add (x re-read here, not held live), final ReLU."""
    out = (h3_ref[...].astype(jnp.float32) * s_ref[...] + t_ref[...]
           + x_ref[...].astype(jnp.float32))
    o_ref[...] = jnp.maximum(out, 0.0).astype(o_ref.dtype)


# --------------------------------------------------------------------------------------
# Host-side helpers
# --------------------------------------------------------------------------------------

def _conv3x3_edge_masks(h, w):
    """(9, h*w) {0,1} masks zeroing out-of-image taps for each 3x3 offset (dh, dw)."""
    m = np.zeros((9, h, w), np.float32)
    t = 0
    for dh in (-1, 0, 1):
        for dw in (-1, 0, 1):
            r0, r1 = max(0, -dh), h - max(0, dh)
            c0, c1 = max(0, -dw), w - max(0, dw)
            m[t, r0:r1, c0:c1] = 1.0
            t += 1
    return m.reshape(9, h * w)


def _bn_scale_bias(stats, gamma, beta, hw):
    """Combine per-image (mean, centered SSQ) partials -> folded BN scale/bias (C, 1)."""
    mu_i = stats[:, :, 0]                                    # (B, C)
    m2_i = stats[:, :, 1]                                    # (B, C)
    mu = jnp.mean(mu_i, axis=0)                              # (C,) batch mean
    var = jnp.mean(m2_i, axis=0) / hw + jnp.mean((mu_i - mu) ** 2, axis=0)  # biased var
    scale = gamma * jax.lax.rsqrt(var + BN_EPS)
    bias = beta - mu * scale
    return scale.reshape(-1, 1), bias.reshape(-1, 1)


def residual_block_forward(x_nchw, params, *, matmul_dtype=jnp.bfloat16):
    """Pallas ResidualBlock forward.  x_nchw: (B, Cin, H, W) -> (B, 4*out_channels, H, W)."""
    B, Cin, H, W = x_nchw.shape
    HW = H * W
    C2 = params["w1"].shape[0]          # out_channels
    C3 = params["w3"].shape[0]          # 4 * out_channels
    assert Cin == C3, "downsample=None requires in_channels == 4 * out_channels"
    assert params["w2"].shape == (C2, C2, 3, 3)

    md = matmul_dtype
    inter_dtype = md                                         # bf16 inter-stage storage
    x_r = x_nchw.reshape(B, Cin, HW)                         # NCHW -> (B, C, HW), free
    w1 = params["w1"].astype(md)                             # (C2, Cin)
    # OIHW -> (O, kh, kw, I) -> (C2, 9*C2): row block t = kh*3+kw matches im2col order.
    w2 = jnp.transpose(params["w2"], (0, 2, 3, 1)).reshape(C2, 9 * C2).astype(md)
    w3 = params["w3"].astype(md)                             # (C3, C2)
    masks = jnp.asarray(_conv3x3_edge_masks(H, W), dtype=jnp.float32)   # (9, HW)

    parallel = pltpu.CompilerParams(dimension_semantics=("parallel",))

    def img_spec(c):          # one image per grid step; batch dim squeezed out
        return pl.BlockSpec((None, c, HW), lambda b: (b, 0, 0))

    def full_spec(shape):     # small operand resident in VMEM across the grid
        return pl.BlockSpec(shape, lambda b: (0,) * len(shape))

    def stat_spec(c):
        return pl.BlockSpec((None, c, 2), lambda b: (b, 0, 0))

    # ---- stage 1: SimAM + conv1 (1x1) + BN1 partial stats ------------------------------
    h1, st1 = pl.pallas_call(
        functools.partial(_simam_conv1_kernel, hw=HW, matmul_dtype=md),
        grid=(B,),
        in_specs=[img_spec(Cin), full_spec((C2, Cin))],
        out_specs=[img_spec(C2), stat_spec(C2)],
        out_shape=[jax.ShapeDtypeStruct((B, C2, HW), inter_dtype),
                   jax.ShapeDtypeStruct((B, C2, 2), jnp.float32)],
        compiler_params=parallel,
    )(x_r, w1)
    s1, t1 = _bn_scale_bias(st1, params["g1"], params["b1"], HW)

    # ---- stage 2: BN1+ReLU, conv2 (3x3 pad 1) as one K=9*C2 matmul, BN2 stats ----------
    h2, st2 = pl.pallas_call(
        functools.partial(_bn1_conv2_kernel, h=H, w=W, matmul_dtype=md),
        grid=(B,),
        in_specs=[img_spec(C2), full_spec((C2, 1)), full_spec((C2, 1)),
                  full_spec((C2, 9 * C2)), full_spec((9, HW))],
        out_specs=[img_spec(C2), stat_spec(C2)],
        out_shape=[jax.ShapeDtypeStruct((B, C2, HW), inter_dtype),
                   jax.ShapeDtypeStruct((B, C2, 2), jnp.float32)],
        compiler_params=parallel,
    )(h1, s1, t1, w2, masks)
    s2, t2 = _bn_scale_bias(st2, params["g2"], params["b2"], HW)

    # ---- stage 3: BN2+ReLU, conv3 (1x1), BN3 stats --------------------------------------
    h3, st3 = pl.pallas_call(
        functools.partial(_bn2_conv3_kernel, hw=HW, matmul_dtype=md),
        grid=(B,),
        in_specs=[img_spec(C2), full_spec((C2, 1)), full_spec((C2, 1)),
                  full_spec((C3, C2))],
        out_specs=[img_spec(C3), stat_spec(C3)],
        out_shape=[jax.ShapeDtypeStruct((B, C3, HW), inter_dtype),
                   jax.ShapeDtypeStruct((B, C3, 2), jnp.float32)],
        compiler_params=parallel,
    )(h2, s2, t2, w3)
    s3, t3 = _bn_scale_bias(st3, params["g3"], params["b3"], HW)

    # ---- stage 4: BN3, residual add, final ReLU -----------------------------------------
    out = pl.pallas_call(
        _bn3_residual_kernel,
        grid=(B,),
        in_specs=[img_spec(C3), full_spec((C3, 1)), full_spec((C3, 1)), img_spec(Cin)],
        out_specs=img_spec(C3),
        out_shape=jax.ShapeDtypeStruct((B, C3, HW), jnp.float32),
        compiler_params=parallel,
    )(h3, s3, t3, x_r)

    return out.reshape(B, C3, H, W)


# --------------------------------------------------------------------------------------
# Pure-JAX (f32) reference with identical module semantics, for the self-check.
# --------------------------------------------------------------------------------------

def reference_forward(x, params):
    B, C, H, W = x.shape
    n = H * W - 1
    mu = x.mean(axis=(2, 3), keepdims=True)
    d2 = (x - mu) ** 2
    y = d2 / (4.0 * (d2.sum(axis=(2, 3), keepdims=True) / n + E_LAMBDA)) + 0.5
    att = x * jax.nn.sigmoid(y)

    def bn(hh, g, b):
        m = hh.mean(axis=(0, 2, 3), keepdims=True)
        v = ((hh - m) ** 2).mean(axis=(0, 2, 3), keepdims=True)
        return (g.reshape(1, -1, 1, 1) * (hh - m) * jax.lax.rsqrt(v + BN_EPS)
                + b.reshape(1, -1, 1, 1))

    h1 = jax.nn.relu(bn(jnp.einsum("oi,bihw->bohw", params["w1"], att),
                        params["g1"], params["b1"]))
    h2 = jax.lax.conv_general_dilated(h1, params["w2"], (1, 1), "SAME",
                                      dimension_numbers=("NCHW", "OIHW", "NCHW"))
    h2 = jax.nn.relu(bn(h2, params["g2"], params["b2"]))
    h3 = bn(jnp.einsum("oi,bihw->bohw", params["w3"], h2), params["g3"], params["b3"])
    return jax.nn.relu(h3 + x)


if __name__ == "__main__":
    B, H, W = 2, 16, 16
    out_channels = 4
    C2 = out_channels
    C3 = 4 * out_channels
    Cin = C3                      # downsample=None => in_channels == 4*out_channels

    key = jax.random.PRNGKey(0)
    ks = jax.random.split(key, 10)
    params = {
        "w1": 0.2 * jax.random.normal(ks[0], (C2, Cin), jnp.float32),       # conv1 (O, I)
        "g1": 1.0 + 0.1 * jax.random.normal(ks[1], (C2,), jnp.float32),
        "b1": 0.1 * jax.random.normal(ks[2], (C2,), jnp.float32),
        "w2": 0.2 * jax.random.normal(ks[3], (C2, C2, 3, 3), jnp.float32),  # conv2 OIHW
        "g2": 1.0 + 0.1 * jax.random.normal(ks[4], (C2,), jnp.float32),
        "b2": 0.1 * jax.random.normal(ks[5], (C2,), jnp.float32),
        "w3": 0.2 * jax.random.normal(ks[6], (C3, C2), jnp.float32),        # conv3 (O, I)
        "g3": 1.0 + 0.1 * jax.random.normal(ks[7], (C3,), jnp.float32),
        "b3": 0.1 * jax.random.normal(ks[8], (C3,), jnp.float32),
    }
    x = jax.random.normal(ks[9], (B, Cin, H, W), jnp.float32)

    out = jax.block_until_ready(jax.jit(residual_block_forward)(x, params))
    ref = jax.block_until_ready(jax.jit(reference_forward)(x, params))

    assert out.shape == (B, C3, H, W), out.shape
    # Mixed abs/rel tolerance: accounts for bf16 MXU operands, bf16 inter-stage storage,
    # and approx EUP reciprocals; structural errors would be O(1) and fail this easily.
    err = jnp.abs(out - ref)
    tol = 5e-2 + 2e-2 * jnp.abs(ref)
    max_excess = float(jnp.max(err - tol))
    max_err = float(jnp.max(err))
    assert max_excess <= 0.0, f"max abs err too large: {max_err}"
    print("KERNEL_OK")
</pallas_src>

<mosaic_0001>
module attributes {stable_mosaic.version = 11 : i64} {
  func.func @_simam_conv1_kernel(%arg0: i32, %arg1: memref<1x16x256xf32, #tpu.memory_space<vmem>>, %arg2: memref<4x16xbf16, #tpu.memory_space<vmem>>, %arg3: memref<1x4x256xbf16, #tpu.memory_space<vmem>>, %arg4: memref<1x4x2xf32, #tpu.memory_space<vmem>>) attributes {dimension_semantics = [#tpu.dimension_semantics<parallel>], iteration_bounds = array<i64: 2>, scalar_prefetch = 0 : i64, scratch_operands = 0 : i64, tpu.core_type = #tpu.core_type<tc>, window_params = [{transform_indices = @transform_0, window_bounds = array<i64: 1, 16, 256>}, {pipeline_mode = #tpu.pipeline_mode<synchronous>, transform_indices = @transform_1, window_bounds = array<i64: 4, 16>}, {transform_indices = @transform_2, window_bounds = array<i64: 1, 4, 256>}, {transform_indices = @transform_3, window_bounds = array<i64: 1, 4, 2>}]} {
    %c0 = arith.constant 0 : index
    %c0_0 = arith.constant 0 : index
    %c0_1 = arith.constant 0 : index
    %0 = vector.load %arg1[%c0, %c0_0, %c0_1] : memref<1x16x256xf32, #tpu.memory_space<vmem>>, vector<1x16x256xf32>
    %1 = vector.shape_cast %0 : vector<1x16x256xf32> to vector<16x256xf32>
    %cst = arith.constant dense<0.000000e+00> : vector<16xf32>
    %2 = vector.multi_reduction <add>, %1, %cst [1] : vector<16x256xf32> to vector<16xf32>
    %3 = vector.shape_cast %2 : vector<16xf32> to vector<16x1xf32>
    %cst_2 = arith.constant 3.906250e-03 : f32
    %4 = vector.broadcast %cst_2 : f32 to vector<16x1xf32>
    %5 = arith.mulf %3, %4 : vector<16x1xf32>
    %6 = vector.broadcast %5 : vector<16x1xf32> to vector<16x256xf32>
    %7 = arith.subf %1, %6 : vector<16x256xf32>
    %8 = arith.mulf %7, %7 : vector<16x256xf32>
    %cst_3 = arith.constant dense<0.000000e+00> : vector<16xf32>
    %9 = vector.multi_reduction <add>, %8, %cst_3 [1] : vector<16x256xf32> to vector<16xf32>
    %10 = vector.shape_cast %9 : vector<16xf32> to vector<16x1xf32>
    %cst_4 = arith.constant 0.00392156886 : f32
    %11 = vector.broadcast %cst_4 : f32 to vector<16x1xf32>
    %12 = arith.mulf %10, %11 : vector<16x1xf32>
    %cst_5 = arith.constant 9.99999974E-5 : f32
    %13 = vector.broadcast %cst_5 : f32 to vector<16x1xf32>
    %14 = arith.addf %12, %13 : vector<16x1xf32>
    %cst_6 = arith.constant 4.000000e+00 : f32
    %15 = vector.broadcast %cst_6 : f32 to vector<16x1xf32>
    %16 = arith.mulf %15, %14 : vector<16x1xf32>
    %17 = tpu.reciprocal %16 {approx = true} : vector<16x1xf32> -> vector<16x1xf32>
    %18 = vector.broadcast %17 : vector<16x1xf32> to vector<16x256xf32>
    %19 = arith.mulf %8, %18 : vector<16x256xf32>
    %cst_7 = arith.constant 5.000000e-01 : f32
    %20 = vector.broadcast %cst_7 : f32 to vector<16x256xf32>
    %21 = arith.addf %19, %20 : vector<16x256xf32>
    %cst_8 = arith.constant 0.000000e+00 : f32
    %22 = vector.broadcast %cst_8 : f32 to vector<16x256xf32>
    %23 = arith.subf %22, %21 : vector<16x256xf32>
    %24 = math.exp %23 : vector<16x256xf32>
    %cst_9 = arith.constant 1.000000e+00 : f32
    %25 = vector.broadcast %cst_9 : f32 to vector<16x256xf32>
    %26 = arith.addf %25, %24 : vector<16x256xf32>
    %27 = tpu.reciprocal %26 {approx = true} : vector<16x256xf32> -> vector<16x256xf32>
    %28 = arith.mulf %1, %27 : vector<16x256xf32>
    %c0_10 = arith.constant 0 : index
    %c0_11 = arith.constant 0 : index
    %29 = vector.load %arg2[%c0_10, %c0_11] : memref<4x16xbf16, #tpu.memory_space<vmem>>, vector<4x16xbf16>
    %30 = arith.truncf %28 : vector<16x256xf32> to vector<16x256xbf16>
    %cst_12 = arith.constant dense<0.000000e+00> : vector<4x256xf32>
    %31 = tpu.matmul %29, %30, %cst_12 {dimension_numbers = #tpu.dot_dimension_numbers<[1], [0], [0], [1], [0, 0, 1, 1], [], []>} : vector<4x16xbf16>, vector<16x256xbf16>, vector<4x256xf32> -> vector<4x256xf32>
    %32 = arith.truncf %31 : vector<4x256xf32> to vector<4x256xbf16>
    %c0_13 = arith.constant 0 : index
    %c0_14 = arith.constant 0 : index
    %c0_15 = arith.constant 0 : index
    %33 = vector.load %arg3[%c0_13, %c0_14, %c0_15] : memref<1x4x256xbf16, #tpu.memory_space<vmem>>, vector<1x4x256xbf16>
    %34 = vector.shape_cast %33 : vector<1x4x256xbf16> to vector<4x256xbf16>
    %35 = vector.shape_cast %32 : vector<4x256xbf16> to vector<1x4x256xbf16>
    tpu.vector_store %arg3[%c0_13, %c0_14, %c0_15], %35 {strides = array<i32>} : memref<1x4x256xbf16, #tpu.memory_space<vmem>>, vector<1x4x256xbf16>,
    %cst_16 = arith.constant dense<0.000000e+00> : vector<4xf32>
    %36 = vector.multi_reduction <add>, %31, %cst_16 [1] : vector<4x256xf32> to vector<4xf32>
    %37 = vector.shape_cast %36 : vector<4xf32> to vector<4x1xf32>
    %cst_17 = arith.constant 3.906250e-03 : f32
    %38 = vector.broadcast %cst_17 : f32 to vector<4x1xf32>
    %39 = arith.mulf %37, %38 : vector<4x1xf32>
    %40 = vector.broadcast %39 : vector<4x1xf32> to vector<4x256xf32>
    %41 = arith.subf %31, %40 : vector<4x256xf32>
    %42 = vector.broadcast %39 : vector<4x1xf32> to vector<4x256xf32>
    %43 = arith.subf %31, %42 : vector<4x256xf32>
    %44 = arith.mulf %41, %43 : vector<4x256xf32>
    %cst_18 = arith.constant dense<0.000000e+00> : vector<4xf32>
    %45 = vector.multi_reduction <add>, %44, %cst_18 [1] : vector<4x256xf32> to vector<4xf32>
    %46 = vector.shape_cast %45 : vector<4xf32> to vector<4x1xf32>
    %47 = tpu.concatenate %39, %46 in 1 : vector<4x1xf32>, vector<4x1xf32> -> vector<4x2xf32>
    %c0_19 = arith.constant 0 : index
    %c0_20 = arith.constant 0 : index
    %c0_21 = arith.constant 0 : index
    %48 = vector.load %arg4[%c0_19, %c0_20, %c0_21] : memref<1x4x2xf32, #tpu.memory_space<vmem>>, vector<1x4x2xf32>
    %49 = vector.shape_cast %48 : vector<1x4x2xf32> to vector<4x2xf32>
    %50 = vector.shape_cast %47 : vector<4x2xf32> to vector<1x4x2xf32>
    tpu.vector_store %arg4[%c0_19, %c0_20, %c0_21], %50 {strides = array<i32>} : memref<1x4x2xf32, #tpu.memory_space<vmem>>, vector<1x4x2xf32>,
    return
  }
  func.func @transform_0(%arg0: i32) -> (i32, i32, i32) {
    %c0_i32 = arith.constant 0 : i32
    %c0_i32_0 = arith.constant 0 : i32
    %c0_i32_1 = arith.constant 0 : i32
    return %arg0, %c0_i32, %c0_i32_0 : i32, i32, i32
  }
  func.func @transform_1(%arg0: i32) -> (i32, i32) {
    %c0_i32 = arith.constant 0 : i32
    %c0_i32_0 = arith.constant 0 : i32
    %c0_i32_1 = arith.constant 0 : i32
    return %c0_i32, %c0_i32_0 : i32, i32
  }
  func.func @transform_2(%arg0: i32) -> (i32, i32, i32) {
    %c0_i32 = arith.constant 0 : i32
    %c0_i32_0 = arith.constant 0 : i32
    %c0_i32_1 = arith.constant 0 : i32
    return %arg0, %c0_i32, %c0_i32_0 : i32, i32, i32
  }
  func.func @transform_3(%arg0: i32) -> (i32, i32, i32) {
    %c0_i32 = arith.constant 0 : i32
    %c0_i32_0 = arith.constant 0 : i32
    %c0_i32_1 = arith.constant 0 : i32
    return %arg0, %c0_i32, %c0_i32_0 : i32, i32, i32
  }
}

module attributes {stable_mosaic.version = 11 : i64} {
  func.func @_bn2_conv3_kernel(%arg0: i32, %arg1: memref<1x4x256xbf16, #tpu.memory_space<vmem>>, %arg2: memref<4x1xf32, #tpu.memory_space<vmem>>, %arg3: memref<4x1xf32, #tpu.memory_space<vmem>>, %arg4: memref<16x4xbf16, #tpu.memory_space<vmem>>, %arg5: memref<1x16x256xbf16, #tpu.memory_space<vmem>>, %arg6: memref<1x16x2xf32, #tpu.memory_space<vmem>>) attributes {dimension_semantics = [#tpu.dimension_semantics<parallel>], iteration_bounds = array<i64: 2>, scalar_prefetch = 0 : i64, scratch_operands = 0 : i64, tpu.core_type = #tpu.core_type<tc>, window_params = [{transform_indices = @transform_0, window_bounds = array<i64: 1, 4, 256>}, {pipeline_mode = #tpu.pipeline_mode<synchronous>, transform_indices = @transform_1, window_bounds = array<i64: 4, 1>}, {pipeline_mode = #tpu.pipeline_mode<synchronous>, transform_indices = @transform_2, window_bounds = array<i64: 4, 1>}, {pipeline_mode = #tpu.pipeline_mode<synchronous>, transform_indices = @transform_3, window_bounds = array<i64: 16, 4>}, {transform_indices = @transform_4, window_bounds = array<i64: 1, 16, 256>}, {transform_indices = @transform_5, window_bounds = array<i64: 1, 16, 2>}]} {
    %c0 = arith.constant 0 : index
    %c0_0 = arith.constant 0 : index
    %c0_1 = arith.constant 0 : index
    %0 = vector.load %arg1[%c0, %c0_0, %c0_1] : memref<1x4x256xbf16, #tpu.memory_space<vmem>>, vector<1x4x256xbf16>
    %1 = vector.shape_cast %0 : vector<1x4x256xbf16> to vector<4x256xbf16>
    %2 = arith.extf %1 : vector<4x256xbf16> to vector<4x256xf32>
    %c0_2 = arith.constant 0 : index
    %c0_3 = arith.constant 0 : index
    %3 = vector.load %arg2[%c0_2, %c0_3] : memref<4x1xf32, #tpu.memory_space<vmem>>, vector<4x1xf32>
    %4 = vector.broadcast %3 : vector<4x1xf32> to vector<4x256xf32>
    %5 = arith.mulf %2, %4 : vector<4x256xf32>
    %c0_4 = arith.constant 0 : index
    %c0_5 = arith.constant 0 : index
    %6 = vector.load %arg3[%c0_4, %c0_5] : memref<4x1xf32, #tpu.memory_space<vmem>>, vector<4x1xf32>
    %7 = vector.broadcast %6 : vector<4x1xf32> to vector<4x256xf32>
    %8 = arith.addf %5, %7 : vector<4x256xf32>
    %cst = arith.constant 0.000000e+00 : f32
    %9 = vector.broadcast %cst : f32 to vector<4x256xf32>
    %10 = arith.maximumf %8, %9 : vector<4x256xf32>
    %c0_6 = arith.constant 0 : index
    %c0_7 = arith.constant 0 : index
    %11 = vector.load %arg4[%c0_6, %c0_7] : memref<16x4xbf16, #tpu.memory_space<vmem>>, vector<16x4xbf16>
    %12 = arith.truncf %10 : vector<4x256xf32> to vector<4x256xbf16>
    %cst_8 = arith.constant dense<0.000000e+00> : vector<16x256xf32>
    %13 = tpu.matmul %11, %12, %cst_8 {dimension_numbers = #tpu.dot_dimension_numbers<[1], [0], [0], [1], [0, 0, 1, 1], [], []>} : vector<16x4xbf16>, vector<4x256xbf16>, vector<16x256xf32> -> vector<16x256xf32>
    %14 = arith.truncf %13 : vector<16x256xf32> to vector<16x256xbf16>
    %c0_9 = arith.constant 0 : index
    %c0_10 = arith.constant 0 : index
    %c0_11 = arith.constant 0 : index
    %15 = vector.load %arg5[%c0_9, %c0_10, %c0_11] : memref<1x16x256xbf16, #tpu.memory_space<vmem>>, vector<1x16x256xbf16>
    %16 = vector.shape_cast %15 : vector<1x16x256xbf16> to vector<16x256xbf16>
    %17 = vector.shape_cast %14 : vector<16x256xbf16> to vector<1x16x256xbf16>
    tpu.vector_store %arg5[%c0_9, %c0_10, %c0_11], %17 {strides = array<i32>} : memref<1x16x256xbf16, #tpu.memory_space<vmem>>, vector<1x16x256xbf16>,
    %cst_12 = arith.constant dense<0.000000e+00> : vector<16xf32>
    %18 = vector.multi_reduction <add>, %13, %cst_12 [1] : vector<16x256xf32> to vector<16xf32>
    %19 = vector.shape_cast %18 : vector<16xf32> to vector<16x1xf32>
    %cst_13 = arith.constant 3.906250e-03 : f32
    %20 = vector.broadcast %cst_13 : f32 to vector<16x1xf32>
    %21 = arith.mulf %19, %20 : vector<16x1xf32>
    %22 = vector.broadcast %21 : vector<16x1xf32> to vector<16x256xf32>
    %23 = arith.subf %13, %22 : vector<16x256xf32>
    %24 = vector.broadcast %21 : vector<16x1xf32> to vector<16x256xf32>
    %25 = arith.subf %13, %24 : vector<16x256xf32>
    %26 = arith.mulf %23, %25 : vector<16x256xf32>
    %cst_14 = arith.constant dense<0.000000e+00> : vector<16xf32>
    %27 = vector.multi_reduction <add>, %26, %cst_14 [1] : vector<16x256xf32> to vector<16xf32>
    %28 = vector.shape_cast %27 : vector<16xf32> to vector<16x1xf32>
    %29 = tpu.concatenate %21, %28 in 1 : vector<16x1xf32>, vector<16x1xf32> -> vector<16x2xf32>
    %c0_15 = arith.constant 0 : index
    %c0_16 = arith.constant 0 : index
    %c0_17 = arith.constant 0 : index
    %30 = vector.load %arg6[%c0_15, %c0_16, %c0_17] : memref<1x16x2xf32, #tpu.memory_space<vmem>>, vector<1x16x2xf32>
    %31 = vector.shape_cast %30 : vector<1x16x2xf32> to vector<16x2xf32>
    %32 = vector.shape_cast %29 : vector<16x2xf32> to vector<1x16x2xf32>
    tpu.vector_store %arg6[%c0_15, %c0_16, %c0_17], %32 {strides = array<i32>} : memref<1x16x2xf32, #tpu.memory_space<vmem>>, vector<1x16x2xf32>,
    return
  }
  func.func @transform_0(%arg0: i32) -> (i32, i32, i32) {
    %c0_i32 = arith.constant 0 : i32
    %c0_i32_0 = arith.constant 0 : i32
    %c0_i32_1 = arith.constant 0 : i32
    return %arg0, %c0_i32, %c0_i32_0 : i32, i32, i32
  }
  func.func @transform_1(%arg0: i32) -> (i32, i32) {
    %c0_i32 = arith.constant 0 : i32
    %c0_i32_0 = arith.constant 0 : i32
    %c0_i32_1 = arith.constant 0 : i32
    return %c0_i32, %c0_i32_0 : i32, i32
  }
  func.func @transform_2(%arg0: i32) -> (i32, i32) {
    %c0_i32 = arith.constant 0 : i32
    %c0_i32_0 = arith.constant 0 : i32
    %c0_i32_1 = arith.constant 0 : i32
    return %c0_i32, %c0_i32_0 : i32, i32
  }
  func.func @transform_3(%arg0: i32) -> (i32, i32) {
    %c0_i32 = arith.constant 0 : i32
    %c0_i32_0 = arith.constant 0 : i32
    %c0_i32_1 = arith.constant 0 : i32
    return %c0_i32, %c0_i32_0 : i32, i32
  }
  func.func @transform_4(%arg0: i32) -> (i32, i32, i32) {
    %c0_i32 = arith.constant 0 : i32
    %c0_i32_0 = arith.constant 0 : i32
    %c0_i32_1 = arith.constant 0 : i32
    return %arg0, %c0_i32, %c0_i32_0 : i32, i32, i32
  }
  func.func @transform_5(%arg0: i32) -> (i32, i32, i32) {
    %c0_i32 = arith.constant 0 : i32
    %c0_i32_0 = arith.constant 0 : i32
    %c0_i32_1 = arith.constant 0 : i32
    return %arg0, %c0_i32, %c0_i32_0 : i32, i32, i32
  }
}

module attributes {stable_mosaic.version = 11 : i64} {
  func.func @_bn1_conv2_kernel(%arg0: i32, %arg1: memref<1x4x256xbf16, #tpu.memory_space<vmem>>, %arg2: memref<4x1xf32, #tpu.memory_space<vmem>>, %arg3: memref<4x1xf32, #tpu.memory_space<vmem>>, %arg4: memref<4x36xbf16, #tpu.memory_space<vmem>>, %arg5: memref<9x256xf32, #tpu.memory_space<vmem>>, %arg6: memref<1x4x256xbf16, #tpu.memory_space<vmem>>, %arg7: memref<1x4x2xf32, #tpu.memory_space<vmem>>) attributes {dimension_semantics = [#tpu.dimension_semantics<parallel>], iteration_bounds = array<i64: 2>, scalar_prefetch = 0 : i64, scratch_operands = 0 : i64, tpu.core_type = #tpu.core_type<tc>, window_params = [{transform_indices = @transform_0, window_bounds = array<i64: 1, 4, 256>}, {pipeline_mode = #tpu.pipeline_mode<synchronous>, transform_indices = @transform_1, window_bounds = array<i64: 4, 1>}, {pipeline_mode = #tpu.pipeline_mode<synchronous>, transform_indices = @transform_2, window_bounds = array<i64: 4, 1>}, {pipeline_mode = #tpu.pipeline_mode<synchronous>, transform_indices = @transform_3, window_bounds = array<i64: 4, 36>}, {pipeline_mode = #tpu.pipeline_mode<synchronous>, transform_indices = @transform_4, window_bounds = array<i64: 9, 256>}, {transform_indices = @transform_5, window_bounds = array<i64: 1, 4, 256>}, {transform_indices = @transform_6, window_bounds = array<i64: 1, 4, 2>}]} {
    %c0 = arith.constant 0 : index
    %c0_0 = arith.constant 0 : index
    %c0_1 = arith.constant 0 : index
    %0 = vector.load %arg1[%c0, %c0_0, %c0_1] : memref<1x4x256xbf16, #tpu.memory_space<vmem>>, vector<1x4x256xbf16>
    %1 = vector.shape_cast %0 : vector<1x4x256xbf16> to vector<4x256xbf16>
    %2 = arith.extf %1 : vector<4x256xbf16> to vector<4x256xf32>
    %c0_2 = arith.constant 0 : index
    %c0_3 = arith.constant 0 : index
    %3 = vector.load %arg2[%c0_2, %c0_3] : memref<4x1xf32, #tpu.memory_space<vmem>>, vector<4x1xf32>
    %4 = vector.broadcast %3 : vector<4x1xf32> to vector<4x256xf32>
    %5 = arith.mulf %2, %4 : vector<4x256xf32>
    %c0_4 = arith.constant 0 : index
    %c0_5 = arith.constant 0 : index
    %6 = vector.load %arg3[%c0_4, %c0_5] : memref<4x1xf32, #tpu.memory_space<vmem>>, vector<4x1xf32>
    %7 = vector.broadcast %6 : vector<4x1xf32> to vector<4x256xf32>
    %8 = arith.addf %5, %7 : vector<4x256xf32>
    %cst = arith.constant 0.000000e+00 : f32
    %9 = vector.broadcast %cst : f32 to vector<4x256xf32>
    %10 = arith.maximumf %8, %9 : vector<4x256xf32>
    %11 = vector.extract_strided_slice %10 {offsets = [0, 239], sizes = [4, 17], strides = [1, 1]} : vector<4x256xf32> to vector<4x17xf32>
    %12 = vector.extract_strided_slice %10 {offsets = [0, 0], sizes = [4, 239], strides = [1, 1]} : vector<4x256xf32> to vector<4x239xf32>
    %13 = tpu.concatenate %11, %12 in 1 : vector<4x17xf32>, vector<4x239xf32> -> vector<4x256xf32>
    %c0_6 = arith.constant 0 : index
    %c0_7 = arith.constant 0 : index
    %14 = vector.load %arg5[%c0_6, %c0_7] : memref<9x256xf32, #tpu.memory_space<vmem>>, vector<1x256xf32>
    %15 = vector.broadcast %14 : vector<1x256xf32> to vector<4x256xf32>
    %16 = arith.mulf %13, %15 : vector<4x256xf32>
    %17 = vector.extract_strided_slice %10 {offsets = [0, 240], sizes = [4, 16], strides = [1, 1]} : vector<4x256xf32> to vector<4x16xf32>
    %18 = vector.extract_strided_slice %10 {offsets = [0, 0], sizes = [4, 240], strides = [1, 1]} : vector<4x256xf32> to vector<4x240xf32>
    %19 = tpu.concatenate %17, %18 in 1 : vector<4x16xf32>, vector<4x240xf32> -> vector<4x256xf32>
    %c1 = arith.constant 1 : index
    %c0_8 = arith.constant 0 : index
    %20 = vector.load %arg5[%c1, %c0_8] : memref<9x256xf32, #tpu.memory_space<vmem>>, vector<1x256xf32>
    %21 = vector.broadcast %20 : vector<1x256xf32> to vector<4x256xf32>
    %22 = arith.mulf %19, %21 : vector<4x256xf32>
    %23 = vector.extract_strided_slice %10 {offsets = [0, 241], sizes = [4, 15], strides = [1, 1]} : vector<4x256xf32> to vector<4x15xf32>
    %24 = vector.extract_strided_slice %10 {offsets = [0, 0], sizes = [4, 241], strides = [1, 1]} : vector<4x256xf32> to vector<4x241xf32>
    %25 = tpu.concatenate %23, %24 in 1 : vector<4x15xf32>, vector<4x241xf32> -> vector<4x256xf32>
    %c2 = arith.constant 2 : index
    %c0_9 = arith.constant 0 : index
    %26 = vector.load %arg5[%c2, %c0_9] : memref<9x256xf32, #tpu.memory_space<vmem>>, vector<1x256xf32>
    %27 = vector.broadcast %26 : vector<1x256xf32> to vector<4x256xf32>
    %28 = arith.mulf %25, %27 : vector<4x256xf32>
    %29 = vector.extract_strided_slice %10 {offsets = [0, 255], sizes = [4, 1], strides = [1, 1]} : vector<4x256xf32> to vector<4x1xf32>
    %30 = vector.extract_strided_slice %10 {offsets = [0, 0], sizes = [4, 255], strides = [1, 1]} : vector<4x256xf32> to vector<4x255xf32>
    %31 = tpu.concatenate %29, %30 in 1 : vector<4x1xf32>, vector<4x255xf32> -> vector<4x256xf32>
    %c3 = arith.constant 3 : index
    %c0_10 = arith.constant 0 : index
    %32 = vector.load %arg5[%c3, %c0_10] : memref<9x256xf32, #tpu.memory_space<vmem>>, vector<1x256xf32>
    %33 = vector.broadcast %32 : vector<1x256xf32> to vector<4x256xf32>
    %34 = arith.mulf %31, %33 : vector<4x256xf32>
    %c4 = arith.constant 4 : index
    %c0_11 = arith.constant 0 : index
    %35 = vector.load %arg5[%c4, %c0_11] : memref<9x256xf32, #tpu.memory_space<vmem>>, vector<1x256xf32>
    %36 = vector.broadcast %35 : vector<1x256xf32> to vector<4x256xf32>
    %37 = arith.mulf %10, %36 : vector<4x256xf32>
    %38 = vector.extract_strided_slice %10 {offsets = [0, 1], sizes = [4, 255], strides = [1, 1]} : vector<4x256xf32> to vector<4x255xf32>
    %39 = vector.extract_strided_slice %10 {offsets = [0, 0], sizes = [4, 1], strides = [1, 1]} : vector<4x256xf32> to vector<4x1xf32>
    %40 = tpu.concatenate %38, %39 in 1 : vector<4x255xf32>, vector<4x1xf32> -> vector<4x256xf32>
    %c5 = arith.constant 5 : index
    %c0_12 = arith.constant 0 : index
    %41 = vector.load %arg5[%c5, %c0_12] : memref<9x256xf32, #tpu.memory_space<vmem>>, vector<1x256xf32>
    %42 = vector.broadcast %41 : vector<1x256xf32> to vector<4x256xf32>
    %43 = arith.mulf %40, %42 : vector<4x256xf32>
    %44 = vector.extract_strided_slice %10 {offsets = [0, 15], sizes = [4, 241], strides = [1, 1]} : vector<4x256xf32> to vector<4x241xf32>
    %45 = vector.extract_strided_slice %10 {offsets = [0, 0], sizes = [4, 15], strides = [1, 1]} : vector<4x256xf32> to vector<4x15xf32>
    %46 = tpu.concatenate %44, %45 in 1 : vector<4x241xf32>, vector<4x15xf32> -> vector<4x256xf32>
    %c6 = arith.constant 6 : index
    %c0_13 = arith.constant 0 : index
    %47 = vector.load %arg5[%c6, %c0_13] : memref<9x256xf32, #tpu.memory_space<vmem>>, vector<1x256xf32>
    %48 = vector.broadcast %47 : vector<1x256xf32> to vector<4x256xf32>
    %49 = arith.mulf %46, %48 : vector<4x256xf32>
    %50 = vector.extract_strided_slice %10 {offsets = [0, 16], sizes = [4, 240], strides = [1, 1]} : vector<4x256xf32> to vector<4x240xf32>
    %51 = vector.extract_strided_slice %10 {offsets = [0, 0], sizes = [4, 16], strides = [1, 1]} : vector<4x256xf32> to vector<4x16xf32>
    %52 = tpu.concatenate %50, %51 in 1 : vector<4x240xf32>, vector<4x16xf32> -> vector<4x256xf32>
    %c7 = arith.constant 7 : index
    %c0_14 = arith.constant 0 : index
    %53 = vector.load %arg5[%c7, %c0_14] : memref<9x256xf32, #tpu.memory_space<vmem>>, vector<1x256xf32>
    %54 = vector.broadcast %53 : vector<1x256xf32> to vector<4x256xf32>
    %55 = arith.mulf %52, %54 : vector<4x256xf32>
    %56 = vector.extract_strided_slice %10 {offsets = [0, 17], sizes = [4, 239], strides = [1, 1]} : vector<4x256xf32> to vector<4x239xf32>
    %57 = vector.extract_strided_slice %10 {offsets = [0, 0], sizes = [4, 17], strides = [1, 1]} : vector<4x256xf32> to vector<4x17xf32>
    %58 = tpu.concatenate %56, %57 in 1 : vector<4x239xf32>, vector<4x17xf32> -> vector<4x256xf32>
    %c8 = arith.constant 8 : index
    %c0_15 = arith.constant 0 : index
    %59 = vector.load %arg5[%c8, %c0_15] : memref<9x256xf32, #tpu.memory_space<vmem>>, vector<1x256xf32>
    %60 = vector.broadcast %59 : vector<1x256xf32> to vector<4x256xf32>
    %61 = arith.mulf %58, %60 : vector<4x256xf32>
    %62 = tpu.concatenate %16, %22, %28, %34, %37, %43, %49, %55, %61 in 0 : vector<4x256xf32>, vector<4x256xf32>, vector<4x256xf32>, vector<4x256xf32>, vector<4x256xf32>, vector<4x256xf32>, vector<4x256xf32>, vector<4x256xf32>, vector<4x256xf32> -> vector<36x256xf32>
    %63 = arith.truncf %62 : vector<36x256xf32> to vector<36x256xbf16>
    %c0_16 = arith.constant 0 : index
    %c0_17 = arith.constant 0 : index
    %64 = vector.load %arg4[%c0_16, %c0_17] : memref<4x36xbf16, #tpu.memory_space<vmem>>, vector<4x36xbf16>
    %cst_18 = arith.constant dense<0.000000e+00> : vector<4x256xf32>
    %65 = tpu.matmul %64, %63, %cst_18 {dimension_numbers = #tpu.dot_dimension_numbers<[1], [0], [0], [1], [0, 0, 1, 1], [], []>} : vector<4x36xbf16>, vector<36x256xbf16>, vector<4x256xf32> -> vector<4x256xf32>
    %66 = arith.truncf %65 : vector<4x256xf32> to vector<4x256xbf16>
    %c0_19 = arith.constant 0 : index
    %c0_20 = arith.constant 0 : index
    %c0_21 = arith.constant 0 : index
    %67 = vector.load %arg6[%c0_19, %c0_20, %c0_21] : memref<1x4x256xbf16, #tpu.memory_space<vmem>>, vector<1x4x256xbf16>
    %68 = vector.shape_cast %67 : vector<1x4x256xbf16> to vector<4x256xbf16>
    %69 = vector.shape_cast %66 : vector<4x256xbf16> to vector<1x4x256xbf16>
    tpu.vector_store %arg6[%c0_19, %c0_20, %c0_21], %69 {strides = array<i32>} : memref<1x4x256xbf16, #tpu.memory_space<vmem>>, vector<1x4x256xbf16>,
    %cst_22 = arith.constant dense<0.000000e+00> : vector<4xf32>
    %70 = vector.multi_reduction <add>, %65, %cst_22 [1] : vector<4x256xf32> to vector<4xf32>
    %71 = vector.shape_cast %70 : vector<4xf32> to vector<4x1xf32>
    %cst_23 = arith.constant 3.906250e-03 : f32
    %72 = vector.broadcast %cst_23 : f32 to vector<4x1xf32>
    %73 = arith.mulf %71, %72 : vector<4x1xf32>
    %74 = vector.broadcast %73 : vector<4x1xf32> to vector<4x256xf32>
    %75 = arith.subf %65, %74 : vector<4x256xf32>
    %76 = vector.broadcast %73 : vector<4x1xf32> to vector<4x256xf32>
    %77 = arith.subf %65, %76 : vector<4x256xf32>
    %78 = arith.mulf %75, %77 : vector<4x256xf32>
    %cst_24 = arith.constant dense<0.000000e+00> : vector<4xf32>
    %79 = vector.multi_reduction <add>, %78, %cst_24 [1] : vector<4x256xf32> to vector<4xf32>
    %80 = vector.shape_cast %79 : vector<4xf32> to vector<4x1xf32>
    %81 = tpu.concatenate %73, %80 in 1 : vector<4x1xf32>, vector<4x1xf32> -> vector<4x2xf32>
    %c0_25 = arith.constant 0 : index
    %c0_26 = arith.constant 0 : index
    %c0_27 = arith.constant 0 : index
    %82 = vector.load %arg7[%c0_25, %c0_26, %c0_27] : memref<1x4x2xf32, #tpu.memory_space<vmem>>, vector<1x4x2xf32>
    %83 = vector.shape_cast %82 : vector<1x4x2xf32> to vector<4x2xf32>
    %84 = vector.shape_cast %81 : vector<4x2xf32> to vector<1x4x2xf32>
    tpu.vector_store %arg7[%c0_25, %c0_26, %c0_27], %84 {strides = array<i32>} : memref<1x4x2xf32, #tpu.memory_space<vmem>>, vector<1x4x2xf32>,
    return
  }
  func.func @transform_0(%arg0: i32) -> (i32, i32, i32) {
    %c0_i32 = arith.constant 0 : i32
    %c0_i32_0 = arith.constant 0 : i32
    %c0_i32_1 = arith.constant 0 : i32
    return %arg0, %c0_i32, %c0_i32_0 : i32, i32, i32
  }
  func.func @transform_1(%arg0: i32) -> (i32, i32) {
    %c0_i32 = arith.constant 0 : i32
    %c0_i32_0 = arith.constant 0 : i32
    %c0_i32_1 = arith.constant 0 : i32
    return %c0_i32, %c0_i32_0 : i32, i32
  }
  func.func @transform_2(%arg0: i32) -> (i32, i32) {
    %c0_i32 = arith.constant 0 : i32
    %c0_i32_0 = arith.constant 0 : i32
    %c0_i32_1 = arith.constant 0 : i32
    return %c0_i32, %c0_i32_0 : i32, i32
  }
  func.func @transform_3(%arg0: i32) -> (i32, i32) {
    %c0_i32 = arith.constant 0 : i32
    %c0_i32_0 = arith.constant 0 : i32
    %c0_i32_1 = arith.constant 0 : i32
    return %c0_i32, %c0_i32_0 : i32, i32
  }
  func.func @transform_4(%arg0: i32) -> (i32, i32) {
    %c0_i32 = arith.constant 0 : i32
    %c0_i32_0 = arith.constant 0 : i32
    %c0_i32_1 = arith.constant 0 : i32
    return %c0_i32, %c0_i32_0 : i32, i32
  }
  func.func @transform_5(%arg0: i32) -> (i32, i32, i32) {
    %c0_i32 = arith.constant 0 : i32
    %c0_i32_0 = arith.constant 0 : i32
    %c0_i32_1 = arith.constant 0 : i32
    return %arg0, %c0_i32, %c0_i32_0 : i32, i32, i32
  }
  func.func @transform_6(%arg0: i32) -> (i32, i32, i32) {
    %c0_i32 = arith.constant 0 : i32
    %c0_i32_0 = arith.constant 0 : i32
    %c0_i32_1 = arith.constant 0 : i32
    return %arg0, %c0_i32, %c0_i32_0 : i32, i32, i32
  }
}

module attributes {stable_mosaic.version = 11 : i64} {
  func.func @_bn3_residual_kernel(%arg0: i32, %arg1: memref<1x16x256xbf16, #tpu.memory_space<vmem>>, %arg2: memref<16x1xf32, #tpu.memory_space<vmem>>, %arg3: memref<16x1xf32, #tpu.memory_space<vmem>>, %arg4: memref<1x16x256xf32, #tpu.memory_space<vmem>>, %arg5: memref<1x16x256xf32, #tpu.memory_space<vmem>>) attributes {dimension_semantics = [#tpu.dimension_semantics<parallel>], iteration_bounds = array<i64: 2>, scalar_prefetch = 0 : i64, scratch_operands = 0 : i64, tpu.core_type = #tpu.core_type<tc>, window_params = [{transform_indices = @transform_0, window_bounds = array<i64: 1, 16, 256>}, {pipeline_mode = #tpu.pipeline_mode<synchronous>, transform_indices = @transform_1, window_bounds = array<i64: 16, 1>}, {pipeline_mode = #tpu.pipeline_mode<synchronous>, transform_indices = @transform_2, window_bounds = array<i64: 16, 1>}, {transform_indices = @transform_3, window_bounds = array<i64: 1, 16, 256>}, {transform_indices = @transform_4, window_bounds = array<i64: 1, 16, 256>}]} {
    %c0 = arith.constant 0 : index
    %c0_0 = arith.constant 0 : index
    %c0_1 = arith.constant 0 : index
    %0 = vector.load %arg1[%c0, %c0_0, %c0_1] : memref<1x16x256xbf16, #tpu.memory_space<vmem>>, vector<1x16x256xbf16>
    %1 = vector.shape_cast %0 : vector<1x16x256xbf16> to vector<16x256xbf16>
    %2 = arith.extf %1 : vector<16x256xbf16> to vector<16x256xf32>
    %c0_2 = arith.constant 0 : index
    %c0_3 = arith.constant 0 : index
    %3 = vector.load %arg2[%c0_2, %c0_3] : memref<16x1xf32, #tpu.memory_space<vmem>>, vector<16x1xf32>
    %4 = vector.broadcast %3 : vector<16x1xf32> to vector<16x256xf32>
    %5 = arith.mulf %2, %4 : vector<16x256xf32>
    %c0_4 = arith.constant 0 : index
    %c0_5 = arith.constant 0 : index
    %6 = vector.load %arg3[%c0_4, %c0_5] : memref<16x1xf32, #tpu.memory_space<vmem>>, vector<16x1xf32>
    %7 = vector.broadcast %6 : vector<16x1xf32> to vector<16x256xf32>
    %8 = arith.addf %5, %7 : vector<16x256xf32>
    %c0_6 = arith.constant 0 : index
    %c0_7 = arith.constant 0 : index
    %c0_8 = arith.constant 0 : index
    %9 = vector.load %arg4[%c0_6, %c0_7, %c0_8] : memref<1x16x256xf32, #tpu.memory_space<vmem>>, vector<1x16x256xf32>
    %10 = vector.shape_cast %9 : vector<1x16x256xf32> to vector<16x256xf32>
    %11 = arith.addf %8, %10 : vector<16x256xf32>
    %cst = arith.constant 0.000000e+00 : f32
    %12 = vector.broadcast %cst : f32 to vector<16x256xf32>
    %13 = arith.maximumf %11, %12 : vector<16x256xf32>
    %c0_9 = arith.constant 0 : index
    %c0_10 = arith.constant 0 : index
    %c0_11 = arith.constant 0 : index
    %14 = vector.load %arg5[%c0_9, %c0_10, %c0_11] : memref<1x16x256xf32, #tpu.memory_space<vmem>>, vector<1x16x256xf32>
    %15 = vector.shape_cast %14 : vector<1x16x256xf32> to vector<16x256xf32>
    %16 = vector.shape_cast %13 : vector<16x256xf32> to vector<1x16x256xf32>
    tpu.vector_store %arg5[%c0_9, %c0_10, %c0_11], %16 {strides = array<i32>} : memref<1x16x256xf32, #tpu.memory_space<vmem>>, vector<1x16x256xf32>,
    return
  }
  func.func @transform_0(%arg0: i32) -> (i32, i32, i32) {
    %c0_i32 = arith.constant 0 : i32
    %c0_i32_0 = arith.constant 0 : i32
    %c0_i32_1 = arith.constant 0 : i32
    return %arg0, %c0_i32, %c0_i32_0 : i32, i32, i32
  }
  func.func @transform_1(%arg0: i32) -> (i32, i32) {
    %c0_i32 = arith.constant 0 : i32
    %c0_i32_0 = arith.constant 0 : i32
    %c0_i32_1 = arith.constant 0 : i32
    return %c0_i32, %c0_i32_0 : i32, i32
  }
  func.func @transform_2(%arg0: i32) -> (i32, i32) {
    %c0_i32 = arith.constant 0 : i32
    %c0_i32_0 = arith.constant 0 : i32
    %c0_i32_1 = arith.constant 0 : i32
    return %c0_i32, %c0_i32_0 : i32, i32
  }
  func.func @transform_3(%arg0: i32) -> (i32, i32, i32) {
    %c0_i32 = arith.constant 0 : i32
    %c0_i32_0 = arith.constant 0 : i32
    %c0_i32_1 = arith.constant 0 : i32
    return %arg0, %c0_i32, %c0_i32_0 : i32, i32, i32
  }
  func.func @transform_4(%arg0: i32) -> (i32, i32, i32) {
    %c0_i32 = arith.constant 0 : i32
    %c0_i32_0 = arith.constant 0 : i32
    %c0_i32_1 = arith.constant 0 : i32
    return %arg0, %c0_i32, %c0_i32_0 : i32, i32, i32
  }
}

</mosaic_0001>

<bundles_post_ra>
// kernel: residual_block_forward.6
= control target key start
LH: loop header
LB: loop body
LE: loop exit
PB: predicated region body
PF: predicated region fallthrough
CT: control target
= control target key end

     0   :  { %s541_s18 = smov 0   ;;  %s578_s0 = inlined_call_operand.vmem [shape: bf16[2,4,256], index: 0, kind: input, shape index: {}]   ;;  %s579_s1 = inlined_call_operand.vmem [shape: f32[4,1], index: 1, kind: input, shape index: {}]   ;;  %s580_s2 = inlined_call_operand.vmem [shape: f32[4,1], index: 2, kind: input, shape index: {}]   ;;  %s581_s3 = inlined_call_operand.vmem [shape: bf16[16,4], index: 3, kind: input, shape index: {}]   ;;  %s582_s4 = inlined_call_operand.vmem [shape: bf16[2,16,256], index: 4, kind: output, shape index: {0}]   ;;  %s583_s5 = inlined_call_operand.vmem [shape: f32[2,16,2], index: 5, kind: output, shape index: {1}]  }
   0x1 LB: > { %s466_s19 = sadd.s32 4294967295, %s507_s18   ;;  %p470_p0 = scmp.ge.s32.totalorder %s507_s18, 1  ;;  %s507_s18 = sphi %s541_s18, %s16_s18  }
   0x2   : > { %p190_p1 = scmp.lt.s32.totalorder %s507_s18, 3 }
   0x4   : > { %p191_p2 = pnand %p470_p0, %p190_p1 }
   0x5   : > { %v241_v0 = vld [vmem:[%s579_s1] sm:$0xf] (!%p191_p2)  ;;  %v509_v1 = vmov (!%p191_p2), 0   ;;  %p223_p3 = scmp.lt.s32.totalorder (!%p191_p2), %s466_s19, 1  ;;  %v510_v3 = vmov (!%p191_p2), 839922192   ;;  %v249_v5 = vlaneseq (!%p191_p2) }
   0x6   : > { %194 = sbr.rel (%p191_p2) target bundleno = 666 (0x29a), region = 36  ;;  %499 = vset.pattern.permute.xlu0 (!%p191_p2), %v509_v1  ;;  %325 = vmatprep.mubr.bf16.mxu0 (!%p191_p2), %v509_v1  ;;  %v255_v2 = vld [vmem:[%s580_s2] sm:$0xf] (!%p191_p2)  ;;  %v247_v4 = vunpack.c.l.s4 (!%p191_p2), %v510_v3  ;;  %vm286_vm0 = vcmask (!%p191_p2), 1041408   ;;  %vm282_vm1 = vcmask (!%p191_p2), 31744   ;;  %vm372_vm2 = vcmask (!%p191_p2), 7168  }
   0x7   : > { %244 = vperm.xlu0 (!%p191_p2), %499, %v241_v0   ;;  %v250_v7 = vshrl.u32 (!%p191_p2), %v249_v5, 7  ;;  %v500_v22 = vld [vmem:[%s581_s3] sm:$0xff] (!%p191_p2)   ;;  %vm375_vm3 = vcmask (!%p191_p2), 15360  }
   0x8   : > { %v248_v6 = vunpack.c.0.s8 (!%p191_p2), %v247_v4 }
   0xa   : > { %v251_v8 = vsub.s32 (!%p191_p2), %v248_v6, %v250_v7 }
   0xb   : > { %258 = vperm.xlu0 (!%p191_p2), %499, %v255_v2  }
   0xd   : > { %s585_s19 = smov (!%p223_p3, %s466_s19), 1 }
   0xe   : > { %s484_s24 = sshll.u32 %s585_s19, 2  ;;  %s485_s30 = sshll.u32 %s585_s19, 4 }
   0xf   : > { %s227_s27 = scalar_lea.vmem %s578_s0, %s484_s24  ;;  %s232_s8 = scalar_lea.vmem %s582_s4, %s485_s30 }
  0x10   : > { %v239_v9 = vld [vmem:[%s227_s27] sm:$0xf]  ;;  %s237_s11 = scalar_lea.vmem %s583_s5, %s485_s30 }
  0x11   : > { %v240_v11 = vunpack.c.l.bf16 %v239_v9 }
  0x86   : > { %v245_v10 = vpop.permute.xlu0 %244 }
  0x87   : > { %v252_v12 = vrot.slane %v245_v10, %v251_v8 }
  0x89   : > { %v254_v14 = vmul.f32 %v252_v12, %v240_v11 }
  0x8a   : > { %v259_v13 = vpop.permute.xlu0 %258 }
  0x8b   : > { %v266_v15 = vrot.slane %v259_v13, %v251_v8 }
  0x8d   : > { %v268_v16 = vadd.f32 %v266_v15, %v254_v14 }
  0x8f   : > { %v269_v17 = vmax.f32 %v268_v16, 0.0 }
  0x91   : > { %v273_v18 = vcombine.high %v269_v17, %v269_v17  ;;  %v275_v19 = vpack.c.bf16 %v269_v17, %v269_v17 }
  0x93   : > { %v276_v20 = vpack.c.bf16 %v273_v18, %v273_v18  ;;  %v288_v21 = vsel %vm286_vm0, %v275_v19, 0 }
  0x95   : > { %478 = vmatprep.subr.msk.bf16.mxu0 %vm286_vm0, %v276_v20 }
  0x96   : > { %294 = vmatpush1.bf16.msra.mxu0 %v288_v21 }
  0x99   : > { %479 = vmatmul.mubr.msk.bf16.vlgmr.msra.gmra.mrb[0].mxu0 %vm282_vm1, %v500_v22 }
 0x16c   : > { %v327_v23 = vpop.f32.mrb[0].mxu0 }
 0x16d   : > { %v329_v24 = vpop.f32.mrb[1].mxu0 }
 0x16e   : > { %v487_v25 = vpack.c.bf16 %v329_v24, %v327_v23  ;;  %v331_v26 = vpop.f32.mrb[2].mxu0  ;;  %v350_v27 = vadd.f32 %v329_v24, %v327_v23 }
 0x16f   : > { %v333_v28 = vpop.f32.mrb[3].mxu0 }
 0x170   : > { %v488_v29 = vpack.c.bf16 %v333_v28, %v331_v26  ;;  %348 = vst [vmem:[%s232_s8] sm:$0xff] %v487_v25  ;;  %351 = vadd.xlane.f32.xlu1 %v350_v27  ;;  %v353_v30 = vadd.f32 %v333_v28, %v331_v26 }
 0x172   : > { %349 = vst [vmem:[%s232_s8 + $0x8] sm:$0xff] %v488_v29 }
 0x174   : > { %354 = vadd.xlane.f32.xlu1 %v353_v30 }
 0x1fd   : > { %v352_v31 = vpop.xlane.xlu1 %351 }
 0x1fe   : > { %v356_v32 = vmul.f32 0.00390625, %v352_v31 }
 0x200   : > { %v358_v33 = vsub.f32 %v327_v23, %v356_v32  ;;  %v359_v34 = vsub.f32 %v329_v24, %v356_v32 }
 0x201   : > { %v355_v35 = vpop.xlane.xlu1 %354 }
 0x202   : > { %v357_v36 = vmul.f32 0.00390625, %v355_v35  ;;  %v362_v37 = vmul.f32 %v358_v33, %v358_v33  ;;  %v363_v38 = vmul.f32 %v359_v34, %v359_v34 }
 0x204   : > { %v366_v39 = vadd.f32 %v363_v38, %v362_v37  ;;  %v360_v40 = vsub.f32 %v331_v26, %v357_v36  ;;  %v361_v41 = vsub.f32 %v333_v28, %v357_v36 }
 0x206   : > { %367 = vadd.xlane.f32.xlu0 %v366_v39  ;;  %v364_v42 = vmul.f32 %v360_v40, %v360_v40  ;;  %v365_v43 = vmul.f32 %v361_v41, %v361_v41 }
 0x208   : > { %v369_v44 = vadd.f32 %v365_v43, %v364_v42 }
 0x20a   : > { %370 = vadd.xlane.f32.xlu1 %v369_v44 }
 0x293   : > { %v368_v45 = vpop.xlane.xlu0 %367 }
 0x294   : > { %v373_v46 = vsel %vm372_vm2, %v356_v32, %v368_v45 }
 0x295   : > { %376 = vst.msk [vmem:[%s237_s11] sm:$0xff] %vm375_vm3, %v373_v46 }
 0x297   : > { %v371_v47 = vpop.xlane.xlu1 %370 }
 0x298   : > { %v374_v48 = vsel %vm372_vm2, %v357_v36, %v371_v47 }
 0x299   : > { %377 = vst.msk [vmem:[%s237_s11 + $0x8] sm:$0xff] %vm375_vm3, %v374_v48 }
 0x29a PF: > { %s16_s18 = sadd.s32 1, %s507_s18  }
 0x29b   : > { %p13_p4 = scmp.ge.s32.totalorder %s16_s18, 4  }
 0x29d   :  { %15 = sbr.rel (!%p13_p4) target bundleno = 1 (0x1), region = 78 }

// kernel: residual_block_forward.4
= control target key start
LH: loop header
LB: loop body
LE: loop exit
PB: predicated region body
PF: predicated region fallthrough
CT: control target
= control target key end

     0   :  { %s492_s12 = smov 0   ;;  %s543_s0 = inlined_call_operand.vmem [shape: f32[2,16,256], index: 0, kind: input, shape index: {}]   ;;  %s544_s1 = inlined_call_operand.vmem [shape: bf16[4,16], index: 1, kind: input, shape index: {}]   ;;  %s545_s2 = inlined_call_operand.vmem [shape: bf16[2,4,256], index: 2, kind: output, shape index: {0}]   ;;  %s546_s3 = inlined_call_operand.vmem [shape: f32[2,4,2], index: 3, kind: output, shape index: {1}]  }
   0x1 LB: > { %s417_s13 = sadd.s32 4294967295, %s469_s12   ;;  %p421_p0 = scmp.ge.s32.totalorder %s469_s12, 1  ;;  %s469_s12 = sphi %s492_s12, %s14_s12  }
   0x2   : > { %p140_p1 = scmp.lt.s32.totalorder %s469_s12, 3 }
   0x4   : > { %p141_p2 = pnand %p421_p0, %p140_p1 }
   0x5   : > { %p168_p3 = scmp.lt.s32.totalorder (!%p141_p2), %s417_s13, 1  ;;  %v471_v20 = vmov (!%p141_p2), 0   ;;  %vm252_vm0 = vcmask (!%p141_p2), 130048   ;;  %vm311_vm1 = vcmask (!%p141_p2), 1043456   ;;  %vm327_vm2 = vcmask (!%p141_p2), 7168  }
   0x6   : > { %144 = sbr.rel (%p141_p2) target bundleno = 884 (0x374), region = 28  ;;  %288 = vmatprep.mubr.bf16.mxu0 (!%p141_p2), %v471_v20  ;;  %vm329_vm3 = vcmask (!%p141_p2), 11264  }
   0xd   : > { %s548_s13 = smov (!%p168_p3, %s417_s13), 1 }
   0xe   : > { %s432_s14 = sshll.u32 %s548_s13, 5  ;;  %s433_s20 = sshll.u32 %s548_s13, 2 }
   0xf   : > { %s172_s17 = scalar_lea.vmem %s543_s0, %s432_s14  ;;  %s177_s23 = scalar_lea.vmem %s545_s2, %s433_s20 }
  0x10   : > { %v506_v0 = vld [vmem:[%s172_s17] sm:$0xff]  ;;  %v508_v1 = vld [vmem:[%s172_s17 + $0x8] sm:$0xff]  ;;  %v510_v2 = vld [vmem:[%s172_s17 + $0x10] sm:$0xff]  ;;  %s181_s26 = scalar_lea.vmem %s546_s3, %s433_s20 }
  0x11   : > { %v187_v3 = vadd.f32 %v508_v1, %v506_v0  ;;  %v514_v4 = vld [vmem:[%s172_s17 + $0x18] sm:$0xff] }
  0x12   : > { %v190_v5 = vadd.f32 %v514_v4, %v510_v2 }
  0x13   : > { %188 = vadd.xlane.f32.xlu0 %v187_v3 }
  0x17   : > { %191 = vadd.xlane.f32.xlu0 %v190_v5  ;;  %v249_v5 = vld [vmem:[%s544_s1] sm:$0x3] }
  0xa0   : > { %v189_v6 = vpop.xlane.xlu0 %188 }
  0xa1   : > { %v193_v7 = vmul.f32 0.00390625, %v189_v6 }
  0xa3   : > { %v195_v8 = vsub.f32 %v506_v0, %v193_v7  ;;  %v196_v9 = vsub.f32 %v508_v1, %v193_v7 }
  0xa4   : > { %v192_v10 = vpop.xlane.xlu0 %191 }
  0xa5   : > { %v194_v11 = vmul.f32 0.00390625, %v192_v10  ;;  %v199_v12 = vmul.f32 %v195_v8, %v195_v8  ;;  %v200_v13 = vmul.f32 %v196_v9, %v196_v9 }
  0xa7   : > { %v197_v14 = vsub.f32 %v510_v2, %v194_v11  ;;  %v198_v15 = vsub.f32 %v514_v4, %v194_v11  ;;  %v203_v16 = vadd.f32 %v200_v13, %v199_v12 }
  0xa9   : > { %v201_v17 = vmul.f32 %v197_v14, %v197_v14  ;;  %v202_v18 = vmul.f32 %v198_v15, %v198_v15  ;;  %204 = vadd.xlane.f32.xlu1 %v203_v16 }
  0xab   : > { %v206_v19 = vadd.f32 %v202_v18, %v201_v17 }
  0xad   : > { %207 = vadd.xlane.f32.xlu1 %v206_v19 }
 0x136   : > { %v205_v21 = vpop.xlane.xlu1 %204 }
 0x137   : > { %v209_v22 = vmul.f32 0.003921569, %v205_v21 }
 0x139   : > { %v211_v23 = vadd.f32 0.0001, %v209_v22 }
 0x13a   : > { %v208_v24 = vpop.xlane.xlu1 %207 }
 0x13b   : > { %v213_v25 = vmul.f32 4.0, %v211_v23  ;;  %v210_v26 = vmul.f32 0.003921569, %v208_v24 }
 0x13d   : > { %443 = vrcp.f32 %v213_v25  ;;  %v212_v27 = vadd.f32 0.0001, %v210_v26 }
 0x13f   : > { %v214_v28 = vmul.f32 4.0, %v212_v27 }
 0x141   : > { %445 = vrcp.f32 %v214_v28 }
 0x147   : > { %v444_v29 = vpop.eup %443 }
 0x148   : > { %v217_v30 = vmul.f32 %v444_v29, %v199_v12  ;;  %v218_v31 = vmul.f32 %v444_v29, %v200_v13 }
 0x14a   : > { %v221_v32 = vadd.f32 0.5, %v217_v30  ;;  %v222_v33 = vadd.f32 0.5, %v218_v31 }
 0x14b   : > { %v446_v34 = vpop.eup %445 }
 0x14c   : > { %v225_v35 = vsub.f32 0.0, %v221_v32  ;;  %v226_v36 = vsub.f32 0.0, %v222_v33  ;;  %v219_v37 = vmul.f32 %v446_v34, %v201_v17  ;;  %v220_v38 = vmul.f32 %v446_v34, %v202_v18 }
 0x14e   : > { %v229_v39 = vmul.f32 1.442695, %v225_v35  ;;  %v231_v40 = vmul.f32 1.442695, %v226_v36  ;;  %v223_v41 = vadd.f32 0.5, %v219_v37  ;;  %v224_v42 = vadd.f32 0.5, %v220_v38 }
 0x150   : > { %447 = vpow2.f32 %v229_v39  ;;  %v227_v43 = vsub.f32 0.0, %v223_v41  ;;  %v228_v44 = vsub.f32 0.0, %v224_v42 }
 0x151   : > { %449 = vpow2.f32 %v231_v40 }
 0x152   : > { %v233_v45 = vmul.f32 1.442695, %v227_v43  ;;  %v235_v46 = vmul.f32 1.442695, %v228_v44 }
 0x154   : > { %451 = vpow2.f32 %v233_v45 }
 0x155   : > { %453 = vpow2.f32 %v235_v46 }
 0x15a   : > { %v448_v47 = vpop.eup %447 }
 0x15b   : > { %v450_v48 = vpop.eup %449  ;;  %v237_v49 = vadd.f32 1.0, %v448_v47 }
 0x15c   : > { %v238_v50 = vadd.f32 1.0, %v450_v48 }
 0x15d   : > { %455 = vrcp.f32 %v237_v49 }
 0x15e   : > { %v452_v51 = vpop.eup %451  ;;  %457 = vrcp.f32 %v238_v50 }
 0x15f   : > { %v454_v52 = vpop.eup %453  ;;  %v239_v53 = vadd.f32 1.0, %v452_v51 }
 0x160   : > { %v240_v54 = vadd.f32 1.0, %v454_v52 }
 0x161   : > { %459 = vrcp.f32 %v239_v53 }
 0x162   : > { %461 = vrcp.f32 %v240_v54 }
 0x167   : > { %v456_v55 = vpop.eup %455 }
 0x168   : > { %v458_v56 = vpop.eup %457  ;;  %v245_v59 = vmul.f32 %v456_v55, %v506_v0 }
 0x169   : > { %v246_v61 = vmul.f32 %v458_v56, %v508_v1 }
 0x16b   : > { %v460_v57 = vpop.eup %459 }
 0x16c   : > { %v462_v58 = vpop.eup %461  ;;  %v247_v60 = vmul.f32 %v460_v57, %v510_v2 }
 0x16d   : > { %v248_v62 = vmul.f32 %v462_v58, %v514_v4 }
 0x16e   : > { %v250_v63 = vpack.c.bf16 %v247_v60, %v245_v59 }
 0x16f   : > { %v251_v3 = vpack.c.bf16 %v248_v62, %v246_v61 }
 0x171   : > { %256 = vmatprep.subr.bf16.mxu0 %v251_v3 }
 0x172   : > { %257 = vmatpush1.bf16.msra.mxu0 %v250_v63 }
 0x175   : > { %427 = vmatmul.mubr.msk.bf16.vlgmr.msra.gmra.mrb[0].mxu0 %vm252_vm0, %v249_v5 }
 0x248   : > { %v290_v6 = vpop.f32.mrb[0].mxu0 }
 0x249   : > { %v292_v0 = vpop.f32.mrb[1].mxu0  ;;  %v312_v1 = vsel %vm311_vm1, %v290_v6, 0.0 }
 0x24a   : > { %v428_v2 = vpack.c.bf16 %v292_v0, %v290_v6  ;;  %v294_v4 = vpop.f32.mrb[2].mxu0  ;;  %v313_v7 = vsel %vm311_vm1, %v292_v0, 0.0 }
 0x24b   : > { %v295_v8 = vpop.f32.mrb[3].mxu0  ;;  %v314_v9 = vadd.f32 %v313_v7, %v312_v1 }
 0x24c   : > { %429 = vst.sshfl [vmem:[%s177_s23] sm:$0x33 pattern:$0x76325410] %v428_v2 }
 0x24d   : > { %315 = vadd.xlane.f32.xlu0 %v314_v9 }
 0x2da   : > { %v316_v10 = vpop.xlane.xlu0 %315 }
 0x2db   : > { %v317_v11 = vmul.f32 0.00390625, %v316_v10 }
 0x2dd   : > { %v318_v12 = vsub.f32 %v290_v6, %v317_v11  ;;  %v319_v13 = vsub.f32 %v292_v0, %v317_v11 }
 0x2df   : > { %v320_v14 = vmul.f32 %v318_v12, %v318_v12  ;;  %v321_v15 = vmul.f32 %v319_v13, %v319_v13 }
 0x2e1   : > { %v322_v16 = vsel %vm311_vm1, %v320_v14, 0.0  ;;  %v323_v17 = vsel %vm311_vm1, %v321_v15, 0.0 }
 0x2e2   : > { %v324_v18 = vadd.f32 %v323_v17, %v322_v16 }
 0x2e4   : > { %325 = vadd.xlane.f32.xlu1 %v324_v18 }
 0x371   : > { %v326_v19 = vpop.xlane.xlu1 %325 }
 0x372   : > { %v328_v20 = vsel %vm327_vm2, %v317_v11, %v326_v19 }
 0x373   : > { %330 = vst.msk [vmem:[%s181_s26] sm:$0xf] %vm329_vm3, %v328_v20 }
 0x374 PF: > { %s14_s12 = sadd.s32 1, %s469_s12  }
 0x375   : > { %p11_p4 = scmp.ge.s32.totalorder %s14_s12, 4  }
 0x377   :  { %13 = sbr.rel (!%p11_p4) target bundleno = 1 (0x1), region = 70 }

// kernel: residual_block_forward.5
= control target key start
LH: loop header
LB: loop body
LE: loop exit
PB: predicated region body
PF: predicated region fallthrough
CT: control target
= control target key end

     0   :  { %s821_s21 = smov 0   ;;  %s940_s0 = inlined_call_operand.vmem [shape: bf16[2,4,256], index: 0, kind: input, shape index: {}]   ;;  %s941_s1 = inlined_call_operand.vmem [shape: f32[4,1], index: 1, kind: input, shape index: {}]   ;;  %s942_s2 = inlined_call_operand.vmem [shape: f32[4,1], index: 2, kind: input, shape index: {}]   ;;  %s943_s3 = inlined_call_operand.vmem [shape: bf16[4,36], index: 3, kind: input, shape index: {}]   ;;  %s944_s4 = inlined_call_operand.vmem [shape: f32[9,256], index: 4, kind: input, shape index: {}]   ;;  %s945_s5 = inlined_call_operand.vmem [shape: bf16[2,4,256], index: 5, kind: output, shape index: {0}]   ;;  %s946_s6 = inlined_call_operand.vmem [shape: f32[2,4,2], index: 6, kind: output, shape index: {1}]  }
   0x1 LB: > { %s723_s22 = sadd.s32 4294967295, %s774_s21   ;;  %p727_p0 = scmp.ge.s32.totalorder %s774_s21, 1  ;;  %s774_s21 = sphi %s821_s21, %s17_s21  }
   0x2   : > { %p215_p1 = scmp.lt.s32.totalorder %s774_s21, 3 }
   0x4   : > { %p216_p2 = pnand %p727_p0, %p215_p1 }
   0x5   : > { %v266_v0 = vld [vmem:[%s941_s1] sm:$0xf] (!%p216_p2)  ;;  %v776_v1 = vmov (!%p216_p2), 0   ;;  %p249_p3 = scmp.lt.s32.totalorder (!%p216_p2), %s723_s22, 1  ;;  %v777_v3 = vmov (!%p216_p2), 839922192   ;;  %v274_v5 = vlaneseq (!%p216_p2) }
   0x6   : > { %219 = sbr.rel (%p216_p2) target bundleno = 813 (0x32d), region = 40  ;;  %767 = vset.pattern.permute.xlu0 (!%p216_p2), %v776_v1  ;;  %596 = vmatprep.mubr.bf16.mxu0 (!%p216_p2), %v776_v1  ;;  %v280_v2 = vld [vmem:[%s942_s2] sm:$0xf] (!%p216_p2)  ;;  %v272_v4 = vunpack.c.l.s4 (!%p216_p2), %v777_v3  ;;  %v736_v13 = vld [vmem:[%s944_s4 + $0x4] ss:$8 sm:$0x3] (!%p216_p2) }
   0x7   : > { %269 = vperm.xlu0 (!%p216_p2), %767, %v266_v0   ;;  %v275_v7 = vshrl.u32 (!%p216_p2), %v274_v5, 7  ;;  %s778_s9 = smov (!%p216_p2), 127   ;;  %s779_s10 = smov (!%p216_p2), 16   ;;  %v735_v31 = vld [vmem:[%s944_s4 + $0x3] ss:$8 sm:$0x3] (!%p216_p2) }
   0x8   : > { %v273_v6 = vunpack.c.0.s8 (!%p216_p2), %v272_v4  ;;  %s780_s11 = smov (!%p216_p2), 112   ;;  %s781_s12 = smov (!%p216_p2), 1   ;;  %vm376_vm0 = vcmask (!%p216_p2), 7168   ;;  %v307_v33 = vld [vmem:[%s944_s4] ss:$8 sm:$0x3] (!%p216_p2) }
   0x9   : > { %v841_v10 = vsub.s32 (!%p216_p2), 0, %v275_v7  ;;  %v843_v11 = vsub.s32 (!%p216_p2), 1, %v275_v7  ;;  %s782_s13 = smov (!%p216_p2), 17   ;;  %s783_s14 = smov (!%p216_p2), 15   ;;  %vm302_vm1 = vcmask (!%p216_p2), 138240   ;;  %vm351_vm2 = vcmask (!%p216_p2), 121856  }
   0xa   : > { %v276_v8 = vsub.s32 (!%p216_p2), %v273_v6, %v275_v7  ;;  %s784_s15 = smov (!%p216_p2), 113   ;;  %s785_s16 = smov (!%p216_p2), 111   ;;  %v734_v34 = vld [vmem:[%s944_s4 + $0x2] ss:$8 sm:$0x3] (!%p216_p2)  ;;  %vm326_vm3 = vcmask (!%p216_p2), 130048  }
   0xb   : > { %283 = vperm.xlu0 (!%p216_p2), %767, %v280_v2   ;;  %v402_v16 = vrot.slane (!%p216_p2), %v736_v13, %v841_v10  ;;  %v406_v17 = vrot.slane (!%p216_p2), %v736_v13, %v843_v11  ;;  %v387_v35 = vrot.slane (!%p216_p2), %v735_v31, %v841_v10  ;;  %v391_v36 = vrot.slane (!%p216_p2), %v735_v31, %v843_v11  ;;  %v733_v37 = vld [vmem:[%s944_s4 + $0x1] ss:$8 sm:$0x3] (!%p216_p2)  ;;  %v737_v43 = vld [vmem:[%s944_s4 + $0x5] ss:$8 sm:$0x3] (!%p216_p2) }
   0xc   : > { %v312_v41 = vrot.slane (!%p216_p2), %v307_v33, %v841_v10  ;;  %v316_v44 = vrot.slane (!%p216_p2), %v307_v33, %v843_v11  ;;  %v362_v45 = vrot.slane (!%p216_p2), %v734_v34, %v841_v10  ;;  %v366_v46 = vrot.slane (!%p216_p2), %v734_v34, %v843_v11  ;;  %v739_v57 = vld [vmem:[%s944_s4 + $0x7] ss:$8 sm:$0x3] (!%p216_p2) }
   0xd   : > { %s948_s22 = smov (!%p249_p3, %s723_s22), 1  ;;  %v407_v22 = vcombine.low %v402_v16, %v406_v17  ;;  %v337_v47 = vrot.slane %v733_v37, %v841_v10  ;;  %v341_v48 = vrot.slane %v733_v37, %v843_v11  ;;  %vm537_vm4 = vcmask 1043456   ;;  %v740_v37 = vld [vmem:[%s944_s4 + $0x10] ss:$8 sm:$0x3] }
   0xe   : > { %s835_s27 = sshll.u32 %s948_s22, 2  ;;  %vm414_vm5 = vcmask 1039360   ;;  %v426_v51 = vrot.slane %v737_v43, %v841_v10  ;;  %v430_v56 = vrot.slane %v737_v43, %v843_v11  ;;  %vm464_vm6 = vcmask 916480  }
   0xf   : > { %s253_s30 = scalar_lea.vmem %s940_s0, %s835_s27  ;;  %v476_v4 = vrot.slane %v739_v57, %v841_v10  ;;  %v480_v5 = vrot.slane %v739_v57, %v843_v11  ;;  %vm439_vm7 = vcmask 924672   ;;  %vm489_vm8 = vcmask 908288   ;;  %s262_s18 = scalar_lea.vmem %s946_s6, %s835_s27 }
  0x10   : > { %v264_v9 = vld [vmem:[%s253_s30] sm:$0xf]  ;;  %v505_v43 = vrot.slane %v740_v37, %v843_v11  ;;  %vm557_vm9 = vcmask 1041408   ;;  %vm553_vm10 = vcmask 293888   ;;  %vm635_vm11 = vcmask 11264  }
  0x11   : > { %v265_v14 = vunpack.c.l.bf16 %v264_v9 }
  0x86   : > { %v270_v12 = vpop.permute.xlu0 %269 }
  0x87   : > { %v277_v15 = vrot.slane %v270_v12, %v276_v8 }
  0x89   : > { %v279_v19 = vmul.f32 %v277_v15, %v265_v14 }
  0x8a   : > { %v284_v18 = vpop.permute.xlu0 %283 }
  0x8b   : > { %v291_v20 = vrot.slane %v284_v18, %v276_v8 }
  0x8d   : > { %v293_v21 = vadd.f32 %v291_v20, %v279_v19 }
  0x8f   : > { %v294_v23 = vmax.f32 %v293_v21, 0.0  ;;  %v738_v21 = vld [vmem:[%s944_s4 + $0x6] ss:$8 sm:$0x3] }
  0x90   : > { %v455_v33 = vrot.slane %v738_v21, %v843_v11 }
  0x91   : > { %410 = vrot.lane.b32.xlu0 %v294_v23, %s778_s9  ;;  %324 = vrot.lane.b32.xlu1 %v294_v23, %s779_s10  ;;  %v850_v24 = vmul.f32 %v407_v22, %v294_v23  ;;  %v296_v25 = vcombine.high %v294_v23, %v294_v23 }
  0x95   : > { %460 = vrot.lane.b32.xlu0 %v294_v23, %s780_s11  ;;  %374 = vrot.lane.b32.xlu1 %v294_v23, %s781_s12 }
  0x99   : > { %300 = vrot.lane.b32.xlu1 %v294_v23, %s782_s13  ;;  %371 = vrot.lane.b32.xlu0 %v296_v25, %s781_s12 }
  0x9d   : > { %349 = vrot.lane.b32.xlu1 %v294_v23, %s783_s14  ;;  %297 = vrot.lane.b32.xlu0 %v296_v25, %s782_s13 }
  0xa1   : > { %346 = vrot.lane.b32.xlu0 %v296_v25, %s783_s14  ;;  %321 = vrot.lane.b32.xlu1 %v296_v25, %s779_s10 }
  0xa5   : > { %435 = vrot.lane.b32.xlu0 %v294_v23, %s784_s15  ;;  %412 = vrot.lane.b32.xlu1 %v296_v25, %s778_s9 }
  0xa9   : > { %485 = vrot.lane.b32.xlu0 %v294_v23, %s785_s16  ;;  %462 = vrot.lane.b32.xlu1 %v296_v25, %s780_s11 }
  0xad   : > { %437 = vrot.lane.b32.xlu1 %v296_v25, %s784_s15  ;;  %s258_s15 = scalar_lea.vmem %s945_s5, %s835_s27 }
  0xb1   : > { %487 = vrot.lane.b32.xlu1 %v296_v25, %s785_s16 }
 0x103   : > { %v411_v26 = vpop.permute.xlu0 %410  ;;  %v325_v27 = vpop.permute.xlu1 %324 }
 0x107   : > { %v852_v28 = vpop.permute.xlu0 %460  ;;  %v375_v29 = vpop.permute.xlu1 %374 }
 0x10b   : > { %v301_v30 = vpop.permute.xlu1 %300  ;;  %v372_v32 = vpop.permute.xlu0 %371 }
 0x10c   : > { %v377_v38 = vsel %vm376_vm0, %v375_v29, %v372_v32  ;;  %v380_v39 = vsel %vm376_vm0, %v372_v32, %v375_v29  ;;  %v451_v32 = vrot.slane %v738_v21, %v841_v10 }
 0x10d   : > { %v394_v49 = vmul.f32 %v387_v35, %v380_v39  ;;  %v395_v50 = vmul.f32 %v391_v36, %v377_v38 }
 0x10f   : > { %v350_v40 = vpop.permute.xlu1 %349  ;;  %v298_v42 = vpop.permute.xlu0 %297  ;;  %v518_v2 = vrot.slane %v394_v49, 4  ;;  %v519_v3 = vrot.slane %v395_v50, 4 }
 0x110   : > { %v303_v52 = vsel %vm302_vm1, %v301_v30, %v298_v42  ;;  %v306_v53 = vsel %vm302_vm1, %v298_v42, %v301_v30  ;;  %v501_v42 = vrot.slane %v740_v37, %v841_v10 }
 0x111   : > { %v319_v6 = vmul.f32 %v312_v41, %v306_v53  ;;  %v320_v7 = vmul.f32 %v316_v44, %v303_v52 }
 0x113   : > { %v347_v54 = vpop.permute.xlu0 %346  ;;  %v322_v55 = vpop.permute.xlu1 %321 }
 0x114   : > { %v352_v58 = vsel %vm351_vm2, %v350_v40, %v347_v54  ;;  %v355_v59 = vsel %vm351_vm2, %v347_v54, %v350_v40  ;;  %v327_v60 = vsel %vm326_vm3, %v325_v27, %v322_v55  ;;  %v330_v61 = vsel %vm326_vm3, %v322_v55, %v325_v27 }
 0x115   : > { %v369_v62 = vmul.f32 %v362_v45, %v355_v59  ;;  %v370_v63 = vmul.f32 %v366_v46, %v352_v58  ;;  %v344_v0 = vmul.f32 %v337_v47, %v330_v61  ;;  %v345_v1 = vmul.f32 %v341_v48, %v327_v60  ;;  %v552_v58 = vld [vmem:[%s943_s3] sm:$0x3] }
 0x117   : > { %v512_v8 = vrot.slane %v344_v0, 4  ;;  %v513_v9 = vrot.slane %v345_v1, 4  ;;  %v413_v12 = vpop.permute.xlu1 %412  ;;  %v541_v15 = vsel %vm537_vm4, %v370_v63, %v519_v3  ;;  %v540_v16 = vsel %vm537_vm4, %v369_v62, %v518_v2  ;;  %v436_v34 = vpop.permute.xlu0 %435 }
 0x118   : > { %v415_v13 = vsel %vm414_vm5, %v411_v26, %v413_v12  ;;  %v419_v14 = vsel %vm414_vm5, %v413_v12, %v411_v26  ;;  %v523_v26 = vcombine.high %v850_v24, %v850_v24 }
 0x119   : > { %v433_v17 = vmul.f32 %v426_v51, %v415_v13  ;;  %v434_v18 = vmul.f32 %v430_v56, %v419_v14  ;;  %v539_v19 = vsel %vm537_vm4, %v320_v7, %v513_v9  ;;  %v538_v20 = vsel %vm537_vm4, %v319_v6, %v512_v8 }
 0x11a   : > { %v547_v22 = vpack.c.bf16 %v541_v15, %v539_v19  ;;  %v546_v23 = vpack.c.bf16 %v540_v16, %v538_v20 }
 0x11b   : > { %v527_v25 = vrot.slane %v433_v17, 4  ;;  %v528_v27 = vrot.slane %v434_v18, 4  ;;  %v463_v29 = vpop.permute.xlu1 %462  ;;  %v486_v48 = vpop.permute.xlu0 %485 }
 0x11c   : > { %v465_v30 = vsel %vm464_vm6, %v852_v28, %v463_v29  ;;  %v469_v31 = vsel %vm464_vm6, %v463_v29, %v852_v28  ;;  %564 = vmatprep.subr.bf16.mxu0 %v547_v22 }
 0x11d   : > { %v483_v35 = vmul.f32 %v476_v4, %v465_v30  ;;  %v484_v36 = vmul.f32 %v480_v5, %v469_v31  ;;  %565 = vmatpush1.bf16.msra.mxu0 %v546_v23  ;;  %v543_v38 = vsel %vm537_vm4, %v523_v26, %v528_v27  ;;  %v542_v39 = vsel %vm537_vm4, %v850_v24, %v527_v25 }
 0x11f   : > { %v438_v40 = vpop.permute.xlu1 %437  ;;  %v533_v44 = vrot.slane %v483_v35, 4  ;;  %v534_v45 = vrot.slane %v484_v36, 4 }
 0x120   : > { %v440_v28 = vsel %vm439_vm7, %v436_v34, %v438_v40  ;;  %v444_v41 = vsel %vm439_vm7, %v438_v40, %v436_v34 }
 0x121   : > { %v458_v46 = vmul.f32 %v451_v32, %v440_v28  ;;  %v459_v47 = vmul.f32 %v455_v33, %v444_v41 }
 0x123   : > { %v488_v49 = vpop.permute.xlu1 %487  ;;  %v545_v50 = vsel %vm537_vm4, %v459_v47, %v534_v45  ;;  %v544_v24 = vsel %vm537_vm4, %v458_v46, %v533_v44 }
 0x124   : > { %v490_v51 = vsel %vm489_vm8, %v486_v48, %v488_v49  ;;  %v494_v52 = vsel %vm489_vm8, %v488_v49, %v486_v48  ;;  %v549_v53 = vpack.c.bf16 %v545_v50, %v543_v38  ;;  %v548_v54 = vpack.c.bf16 %v544_v24, %v542_v39 }
 0x125   : > { %v508_v55 = vmul.f32 %v501_v42, %v490_v51  ;;  %v509_v56 = vmul.f32 %v505_v43, %v494_v52 }
 0x126   : > { %566 = vmatprep.subr.bf16.mxu0 %v549_v53 }
 0x127   : > { %v550_v10 = vpack.c.bf16 %v508_v55, %v508_v55  ;;  %v551_v11 = vpack.c.bf16 %v509_v56, %v509_v56  ;;  %567 = vmatpush1.bf16.msra.mxu0 %v548_v54 }
 0x129   : > { %741 = vmatprep.subr.msk.bf16.mxu0 %vm557_vm9, %v551_v11  ;;  %v559_v57 = vsel %vm557_vm9, %v550_v10, 0 }
 0x12b   : > { %569 = vmatpush1.bf16.msra.mxu0 %v559_v57 }
 0x12e   : > { %742 = vmatmul.mubr.msk.bf16.vlgmr.msra.gmra.mrb[0].mxu0 %vm553_vm10, %v552_v58 }
 0x201   : > { %v598_v59 = vpop.f32.mrb[0].mxu0 }
 0x202   : > { %v600_v60 = vpop.f32.mrb[1].mxu0  ;;  %v619_v61 = vsel %vm537_vm4, %v598_v59, 0.0 }
 0x203   : > { %v743_v62 = vpack.c.bf16 %v600_v60, %v598_v59  ;;  %v602_v63 = vpop.f32.mrb[2].mxu0  ;;  %v620_v0 = vsel %vm537_vm4, %v600_v60, 0.0 }
 0x204   : > { %v603_v1 = vpop.f32.mrb[3].mxu0  ;;  %v621_v2 = vadd.f32 %v620_v0, %v619_v61 }
 0x205   : > { %744 = vst.sshfl [vmem:[%s258_s15] sm:$0x33 pattern:$0x76325410] %v743_v62 }
 0x206   : > { %622 = vadd.xlane.f32.xlu0 %v621_v2 }
 0x293   : > { %v623_v3 = vpop.xlane.xlu0 %622 }
 0x294   : > { %v624_v4 = vmul.f32 0.00390625, %v623_v3 }
 0x296   : > { %v625_v5 = vsub.f32 %v598_v59, %v624_v4  ;;  %v626_v6 = vsub.f32 %v600_v60, %v624_v4 }
 0x298   : > { %v627_v7 = vmul.f32 %v625_v5, %v625_v5  ;;  %v628_v8 = vmul.f32 %v626_v6, %v626_v6 }
 0x29a   : > { %v629_v9 = vsel %vm537_vm4, %v627_v7, 0.0  ;;  %v630_v12 = vsel %vm537_vm4, %v628_v8, 0.0 }
 0x29b   : > { %v631_v13 = vadd.f32 %v630_v12, %v629_v9 }
 0x29d   : > { %632 = vadd.xlane.f32.xlu1 %v631_v13 }
 0x32a   : > { %v633_v14 = vpop.xlane.xlu1 %632 }
 0x32b   : > { %v634_v15 = vsel %vm376_vm0, %v624_v4, %v633_v14 }
 0x32c   : > { %636 = vst.msk [vmem:[%s262_s18] sm:$0xf] %vm635_vm11, %v634_v15 }
 0x32d PF: > { %s17_s21 = sadd.s32 1, %s774_s21  }
 0x32e   : > { %p14_p4 = scmp.ge.s32.totalorder %s17_s21, 4  }
 0x330   :  { %16 = sbr.rel (!%p14_p4) target bundleno = 1 (0x1), region = 90 }

// kernel: residual_block_forward.7
= control target key start
LH: loop header
LB: loop body
LE: loop exit
PB: predicated region body
PF: predicated region fallthrough
CT: control target
= control target key end

     0   :  { %s400_s15 = smov 0   ;;  %s432_s0 = inlined_call_operand.vmem [shape: bf16[2,16,256], index: 0, kind: input, shape index: {}]   ;;  %s433_s1 = inlined_call_operand.vmem [shape: f32[16,1], index: 1, kind: input, shape index: {}]   ;;  %s434_s2 = inlined_call_operand.vmem [shape: f32[16,1], index: 2, kind: input, shape index: {}]   ;;  %s435_s3 = inlined_call_operand.vmem [shape: f32[2,16,256], index: 3, kind: input, shape index: {}]   ;;  %s436_s4 = inlined_call_operand.vmem [shape: f32[2,16,256], index: 4, kind: output, shape index: {}]  }
   0x1 LB: > { %s339_s16 = sadd.s32 4294967295, %s372_s15   ;;  %p343_p0 = scmp.ge.s32.totalorder %s372_s15, 1  ;;  %s372_s15 = sphi %s400_s15, %s14_s15  }
   0x2   : > { %p172_p1 = scmp.lt.s32.totalorder %s372_s15, 3 }
   0x4   : > { %p173_p2 = pnand %p343_p0, %p172_p1 }
   0x5   : > { %v240_v0 = vld [vmem:[%s434_s2] sm:$0xff] (!%p173_p2)  ;;  %v374_v2 = vmov (!%p173_p2), 0   ;;  %v241_v3 = vld [vmem:[%s434_s2 + $0x8] sm:$0xff] (!%p173_p2)  ;;  %p203_p3 = scmp.lt.s32.totalorder (!%p173_p2), %s339_s16, 1 }
   0x6   : > { %176 = sbr.rel (%p173_p2) target bundleno = 148 (0x94), region = 36  ;;  %v224_v1 = vld [vmem:[%s433_s1] sm:$0xff] (!%p173_p2)  ;;  %365 = vset.pattern.permute.xlu1 (!%p173_p2), %v374_v2  ;;  %364 = vset.pattern.permute.xlu0 (!%p173_p2), %v374_v2  ;;  %v225_v4 = vld [vmem:[%s433_s1 + $0x8] sm:$0xff] (!%p173_p2) }
   0x7   : > { %244 = vperm.xlu1 (!%p173_p2), %365, %v240_v0   ;;  %228 = vperm.xlu0 (!%p173_p2), %364, %v224_v1  }
   0xb   : > { %249 = vperm.xlu1 (!%p173_p2), %365, %v241_v3   ;;  %233 = vperm.xlu0 (!%p173_p2), %364, %v225_v4  }
   0xd   : > { %s438_s16 = smov (!%p203_p3, %s339_s16), 1 }
   0xe   : > { %s352_s25 = sshll.u32 %s438_s16, 4  ;;  %s353_s29 = sshll.u32 %s438_s16, 5 }
   0xf   : > { %s207_s28 = scalar_lea.vmem %s432_s0, %s352_s25  ;;  %s212_s6 = scalar_lea.vmem %s435_s3, %s353_s29 }
  0x10   : > { %v218_v5 = vld [vmem:[%s207_s28] sm:$0xff]  ;;  %v219_v8 = vld [vmem:[%s207_s28 + $0x8] sm:$0xff]  ;;  %s217_s9 = scalar_lea.vmem %s436_s4, %s353_s29  ;;  %v258_v25 = vld [vmem:[%s212_s6 + $0x10] sm:$0xff] }
  0x11   : > { %v220_v6 = vunpack.c.l.bf16 %v218_v5  ;;  %v221_v7 = vunpack.c.h.bf16 %v218_v5  ;;  %v222_v13 = vunpack.c.l.bf16 %v219_v8  ;;  %v223_v14 = vunpack.c.h.bf16 %v219_v8  ;;  %v256_v15 = vld [vmem:[%s212_s6] sm:$0xff]  ;;  %v257_v16 = vld [vmem:[%s212_s6 + $0x8] sm:$0xff]  ;;  %v259_v26 = vld [vmem:[%s212_s6 + $0x18] sm:$0xff] }
  0x86   : > { %v245_v9 = vpop.permute.xlu1 %244  ;;  %v229_v10 = vpop.permute.xlu0 %228 }
  0x87   : > { %v236_v11 = vmul.f32 %v229_v10, %v220_v6  ;;  %v237_v12 = vmul.f32 %v229_v10, %v221_v7 }
  0x89   : > { %v252_v17 = vadd.f32 %v245_v9, %v236_v11  ;;  %v253_v18 = vadd.f32 %v245_v9, %v237_v12 }
  0x8a   : > { %v234_v19 = vpop.permute.xlu0 %233  ;;  %v250_v24 = vpop.permute.xlu1 %249 }
  0x8b   : > { %v260_v20 = vadd.f32 %v256_v15, %v252_v17  ;;  %v261_v21 = vadd.f32 %v257_v16, %v253_v18  ;;  %v238_v22 = vmul.f32 %v234_v19, %v222_v13  ;;  %v239_v23 = vmul.f32 %v234_v19, %v223_v14 }
  0x8d   : > { %v264_v27 = vmax.f32 %v260_v20, 0.0  ;;  %v265_v28 = vmax.f32 %v261_v21, 0.0  ;;  %v254_v29 = vadd.f32 %v250_v24, %v238_v22  ;;  %v255_v30 = vadd.f32 %v250_v24, %v239_v23 }
  0x8f   : > { %268 = vst [vmem:[%s217_s9] sm:$0xff] %v264_v27  ;;  %269 = vst [vmem:[%s217_s9 + $0x8] sm:$0xff] %v265_v28  ;;  %v262_v31 = vadd.f32 %v258_v25, %v254_v29  ;;  %v263_v32 = vadd.f32 %v259_v26, %v255_v30 }
  0x91   : > { %v266_v33 = vmax.f32 %v262_v31, 0.0  ;;  %v267_v34 = vmax.f32 %v263_v32, 0.0 }
  0x93   : > { %270 = vst [vmem:[%s217_s9 + $0x10] sm:$0xff] %v266_v33  ;;  %271 = vst [vmem:[%s217_s9 + $0x18] sm:$0xff] %v267_v34 }
  0x94 PF: > { %s14_s15 = sadd.s32 1, %s372_s15  }
  0x95   : > { %p11_p4 = scmp.ge.s32.totalorder %s14_s15, 4  }
  0x97   :  { %13 = sbr.rel (!%p11_p4) target bundleno = 1 (0x1), region = 69 }

</bundles_post_ra>
